<compile_context>
chip_gen: v7x
topology: tpu7x:2x2x1
jax: 0.10.0
libtpu: 0.0.40
codegen_flags: <defaults>
</compile_context>

<pallas_src>
import math

import jax
import jax.numpy as jnp
from jax.experimental import pallas as pl
from jax.experimental.pallas import tpu as pltpu

_TARGET_TILE_BYTES = 4 * 1024 * 1024       # ~4 MiB per stream per grid step
_VMEM_LIMIT_BYTES = 40 * 1024 * 1024       # 3 streams x 2 bufs x 4 MiB = 24 MiB resident


def _round_up(x: int, m: int) -> int:
    return ((x + m - 1) // m) * m


def _alpha_blend_kernel(alpha_ref, xs_ref, xt_ref, o_ref):
    # alpha_ref: (1,) f32 in SMEM — already-sigmoided mix factor.
    # xs_ref / xt_ref / o_ref: (tr, cols) VMEM tiles.
    alpha = alpha_ref[0]                                  # f32 scalar
    a = alpha.astype(xs_ref.dtype)
    b = (jnp.float32(1.0) - alpha).astype(xs_ref.dtype)
    o_ref[...] = a * xs_ref[...] + b * xt_ref[...]


def alpha_blender_forward(mix_factor: jax.Array,
                          x_spatial: jax.Array,
                          x_temporal: jax.Array) -> jax.Array:
    """Pallas implementation of AlphaBlender.forward (merge_strategy='learned').

    mix_factor: shape (1,) learnable parameter (pre-sigmoid), float32.
    x_spatial / x_temporal: tensors of identical shape & dtype (e.g. NCHW).
    """
    assert x_spatial.shape == x_temporal.shape
    assert x_spatial.dtype == x_temporal.dtype
    orig_shape = x_spatial.shape
    dtype = x_spatial.dtype
    itemsize = jnp.dtype(dtype).itemsize

    # Hoist the sigmoid out of the kernel — computed once, not once per grid step.
    alpha = jax.nn.sigmoid(mix_factor.astype(jnp.float32)).reshape(1)

    total = math.prod(orig_shape)
    xs_flat = x_spatial.reshape(-1)      # free (contiguous reshape)
    xt_flat = x_temporal.reshape(-1)

    # Pick the widest lane-dense column width that divides the element count so
    # the reshape into the 2-D slab is a free bitcast (no padded copies).
    cols = 1024
    for c in (1024, 512, 256, 128):
        if total % c == 0:
            cols = c
            break

    rows = total // cols
    main = rows * cols
    rem = total - main

    def _jnp_blend(xs, xt):
        a = alpha[0].astype(dtype)
        b = (jnp.float32(1.0) - alpha[0]).astype(dtype)
        return a * xs + b * xt

    if rows == 0:
        # Tiny tensor (< 128 elements): not worth a kernel launch.
        return _jnp_blend(x_spatial, x_temporal)

    if rem == 0:
        xs_main = xs_flat.reshape(rows, cols)
        xt_main = xt_flat.reshape(rows, cols)
    else:
        # Ragged tail handled outside the slab (see below).  Only the main
        # multiple-of-cols prefix goes through the kernel.
        xs_main = xs_flat[:main].reshape(rows, cols)
        xt_main = xt_flat[:main].reshape(rows, cols)

    # Row tile sized by bytes so bf16/f32 see the same DMA chunk size; keep it
    # a multiple of the dtype's sublane packing (f32:8, bf16:16, int8:32).
    sub = max(8, 32 // itemsize)
    max_tr = max(sub, (_TARGET_TILE_BYTES // (cols * itemsize)) // sub * sub)

    if rows <= sub:
        tr = rows                                            # one full-extent block
    elif rows <= 2 * max_tr:
        # Guarantee >= 2 grid steps so both v7x TensorCores get work.
        tr = min(max_tr, _round_up(pl.cdiv(rows, 2), sub))
    else:
        tr = max_tr

    grid = (pl.cdiv(rows, tr),)          # ragged last row-block is masked by Pallas

    out_main = pl.pallas_call(
        _alpha_blend_kernel,
        out_shape=jax.ShapeDtypeStruct((rows, cols), dtype),
        grid_spec=pl.GridSpec(
            grid=grid,
            in_specs=[
                pl.BlockSpec(memory_space=pltpu.MemorySpace.SMEM),   # alpha scalar
                pl.BlockSpec((tr, cols), lambda i: (i, 0)),          # x_spatial
                pl.BlockSpec((tr, cols), lambda i: (i, 0)),          # x_temporal
            ],
            out_specs=pl.BlockSpec((tr, cols), lambda i: (i, 0)),
        ),
        compiler_params=pltpu.CompilerParams(
            dimension_semantics=("parallel",),       # v7x: shard row blocks over 2 TCs
            vmem_limit_bytes=_VMEM_LIMIT_BYTES,
        ),
        cost_estimate=pl.CostEstimate(
            flops=2 * main,
            transcendentals=0,
            bytes_accessed=3 * main * itemsize,
        ),
    )(alpha, xs_main, xt_main)

    if rem == 0:
        return out_main.reshape(orig_shape)

    # <cols-element tail: blend in plain jnp (negligible traffic) and stitch.
    out_tail = _jnp_blend(xs_flat[main:], xt_flat[main:])
    return jnp.concatenate([out_main.reshape(-1), out_tail]).reshape(orig_shape)


def alpha_blender_ref(mix_factor, x_spatial, x_temporal):
    """Pure-JAX reference of the PyTorch forward (merge_strategy='learned')."""
    alpha = jax.nn.sigmoid(mix_factor.astype(jnp.float32))[0]
    a = alpha.astype(x_spatial.dtype)
    b = (jnp.float32(1.0) - alpha).astype(x_spatial.dtype)
    return a * x_spatial + b * x_temporal


if __name__ == "__main__":
    key = jax.random.PRNGKey(0)
    k1, k2, k3, k4 = jax.random.split(key, 4)

    # Deterministic parameter init: AlphaBlender(alpha=0.5, 'learned', ...)
    mix_factor = jnp.array([0.5], dtype=jnp.float32)

    # Case 1: small NCHW shape (module's typical usage), aligned zero-copy path.
    xs = jax.random.normal(k1, (2, 4, 16, 16), dtype=jnp.float32)
    xt = jax.random.normal(k2, (2, 4, 16, 16), dtype=jnp.float32)
    out = jax.block_until_ready(alpha_blender_forward(mix_factor, xs, xt))
    ref = alpha_blender_ref(mix_factor, xs, xt)
    assert out.shape == xs.shape and out.dtype == xs.dtype
    assert jnp.allclose(out, ref, atol=1e-6, rtol=1e-6), "case1 mismatch"

    # Case 2: odd spatial dims -> exercises the ragged-tail path (no full pads).
    xs = jax.random.normal(k3, (2, 3, 17, 17), dtype=jnp.float32)
    xt = jax.random.normal(k4, (2, 3, 17, 17), dtype=jnp.float32)
    out = jax.block_until_ready(alpha_blender_forward(mix_factor, xs, xt))
    ref = alpha_blender_ref(mix_factor, xs, xt)
    assert jnp.allclose(out, ref, atol=1e-6, rtol=1e-6), "case2 mismatch"

    # Case 3: larger activation -> multi-step pipelined grid over row tiles.
    xs = jax.random.normal(k1, (2, 8, 256, 256), dtype=jnp.float32)
    xt = jax.random.normal(k2, (2, 8, 256, 256), dtype=jnp.float32)
    out = jax.block_until_ready(alpha_blender_forward(mix_factor, xs, xt))
    ref = alpha_blender_ref(mix_factor, xs, xt)
    assert jnp.allclose(out, ref, atol=1e-6, rtol=1e-6), "case3 mismatch"

    # Case 4: bf16 activations -> byte-sized row tile (16-row sublane multiple).
    xs = jax.random.normal(k3, (2, 8, 64, 64), dtype=jnp.bfloat16)
    xt = jax.random.normal(k4, (2, 8, 64, 64), dtype=jnp.bfloat16)
    out = jax.block_until_ready(alpha_blender_forward(mix_factor, xs, xt))
    ref = alpha_blender_ref(mix_factor, xs, xt)
    assert out.dtype == jnp.bfloat16
    assert jnp.allclose(out.astype(jnp.float32), ref.astype(jnp.float32),
                        atol=5e-2, rtol=5e-2), "case4 mismatch"

    # TODO(synk): 'fixed' / 'learned_with_images' merge strategies (rearranged
    # per-image alpha) are not implemented; only the 'learned' scalar path is.
    print("KERNEL_OK")
</pallas_src>

<mosaic_0001>
module attributes {stable_mosaic.version = 11 : i64} {
  func.func @_alpha_blend_kernel(%arg0: i32, %arg1: memref<1xf32, #tpu.memory_space<smem>>, %arg2: memref<2x1024xf32, #tpu.memory_space<vmem>>, %arg3: memref<2x1024xf32, #tpu.memory_space<vmem>>, %arg4: memref<2x1024xf32, #tpu.memory_space<vmem>>) attributes {dimension_semantics = [#tpu.dimension_semantics<parallel>], iteration_bounds = array<i64: 1>, scalar_prefetch = 0 : i64, scratch_operands = 0 : i64, tpu.core_type = #tpu.core_type<tc>, window_params = [{transform_indices = @transform_0, window_bounds = array<i64: 1>}, {transform_indices = @transform_1, window_bounds = array<i64: 2, 1024>}, {transform_indices = @transform_2, window_bounds = array<i64: 2, 1024>}, {transform_indices = @transform_3, window_bounds = array<i64: 2, 1024>}]} {
    %c0 = arith.constant 0 : index
    %0 = memref.load %arg1[%c0] : memref<1xf32, #tpu.memory_space<smem>>
    %cst = arith.constant 1.000000e+00 : f32
    %1 = arith.subf %cst, %0 : f32
    %c0_0 = arith.constant 0 : index
    %c0_1 = arith.constant 0 : index
    %2 = vector.load %arg2[%c0_0, %c0_1] : memref<2x1024xf32, #tpu.memory_space<vmem>>, vector<2x1024xf32>
    %3 = vector.broadcast %0 : f32 to vector<2x1024xf32>
    %4 = arith.mulf %3, %2 : vector<2x1024xf32>
    %c0_2 = arith.constant 0 : index
    %c0_3 = arith.constant 0 : index
    %5 = vector.load %arg3[%c0_2, %c0_3] : memref<2x1024xf32, #tpu.memory_space<vmem>>, vector<2x1024xf32>
    %6 = vector.broadcast %1 : f32 to vector<2x1024xf32>
    %7 = arith.mulf %6, %5 : vector<2x1024xf32>
    %8 = arith.addf %4, %7 : vector<2x1024xf32>
    %c0_4 = arith.constant 0 : index
    %c0_5 = arith.constant 0 : index
    %9 = vector.load %arg4[%c0_4, %c0_5] : memref<2x1024xf32, #tpu.memory_space<vmem>>, vector<2x1024xf32>
    tpu.vector_store %arg4[%c0_4, %c0_5], %8 {strides = array<i32>} : memref<2x1024xf32, #tpu.memory_space<vmem>>, vector<2x1024xf32>,
    return
  }
  func.func @transform_0(%arg0: i32) -> i32 {
    %c0_i32 = arith.constant 0 : i32
    %c0_i32_0 = arith.constant 0 : i32
    return %c0_i32 : i32
  }
  func.func @transform_1(%arg0: i32) -> (i32, i32) {
    %c0_i32 = arith.constant 0 : i32
    %c0_i32_0 = arith.constant 0 : i32
    return %arg0, %c0_i32 : i32, i32
  }
  func.func @transform_2(%arg0: i32) -> (i32, i32) {
    %c0_i32 = arith.constant 0 : i32
    %c0_i32_0 = arith.constant 0 : i32
    return %arg0, %c0_i32 : i32, i32
  }
  func.func @transform_3(%arg0: i32) -> (i32, i32) {
    %c0_i32 = arith.constant 0 : i32
    %c0_i32_0 = arith.constant 0 : i32
    return %arg0, %c0_i32 : i32, i32
  }
}

</mosaic_0001>

<bundles_post_ra>
// kernel: tpu_custom_call.1
= control target key start
LH: loop header
LB: loop body
LE: loop exit
PB: predicated region body
PF: predicated region fallthrough
CT: control target
= control target key end

     0   :  { %9 = vsyncpa [#allocation4], 0  ;;  %s212_s0 = inlined_call_operand.<no memory space> [shape: f32[1], index: 0, kind: input, shape index: {}]   ;;  %s213_s1 = inlined_call_operand.hbm [shape: f32[2,1024], index: 1, kind: input, shape index: {}]   ;;  %s214_s2 = inlined_call_operand.hbm [shape: f32[2,1024], index: 2, kind: input, shape index: {}]   ;;  %s215_s3 = inlined_call_operand.hbm [shape: f32[2,1024], index: 3, kind: output, shape index: {}]  }
   0x1   :  { %10 = vsyncpa [#allocation7], 0 }
   0x2   :  { %11 = vsyncpa [#allocation5], 0  ;;  %s147_s12 = smov [#allocation3]   ;;  %s148_s14 = smov [#allocation6]  }
   0x3   :  { %s20_s13 = sshll.u32 %s147_s12, 4  ;;  %s30_s15 = sshll.u32 %s148_s14, 4  ;;  %s21_s13 = int_to_ptr.vmem [resolvable:$true] %s20_s13  ;;  %s31_s15 = int_to_ptr.vmem [resolvable:$true] %s30_s15 }
   0x4   :  { %s75_s18 = scalar_lea.hbm %s213_s1, 256 }
   0x5   :  { %p76_p0 = scmp.ne.s32.totalorder %s213_s1, %s75_s18  ;;  %p79_p1 = scmp.lt.u32.totalorder %s75_s18, %s213_s1 }
   0x7   :  { %p81_p2 = pnand %p79_p1, %p76_p0 }
   0x9   :  { %84 = shalt.err (!%p81_p2)
}
   0xa   :  { %s85_s23 = scalar_lea.vmem %s21_s13, 256  ;;  %p90_p4 = scmp.lt.s32.totalorder %s21_s13, %s21_s13 }
   0xb   :  { %p86_p3 = scmp.ne.s32.totalorder %s21_s13, %s85_s23  ;;  %p91_p5 = scmp.lt.s32.totalorder %s85_s23, %s85_s23 }
   0xd   :  { %p92_p6 = por %p91_p5, %p90_p4 }
   0xf   :  { %p93_p7 = pnand %p92_p6, %p86_p3 }
  0x11   :  { %96 = shalt.err (!%p93_p7)
}
  0x12   :  { %23 = dma.hbm_to_vmem [thread:$0]  %s213_s1, 256, %s21_s13, [#allocation4]  }
  0x13   :  { %s97_s28 = scalar_lea.hbm %s214_s2, 256 }
  0x14   :  { %p98_p8 = scmp.ne.s32.totalorder %s214_s2, %s97_s28  ;;  %p101_p9 = scmp.lt.u32.totalorder %s97_s28, %s214_s2 }
  0x16   :  { %p103_p10 = pnand %p101_p9, %p98_p8 }
  0x18   :  { %106 = shalt.err (!%p103_p10)
}
  0x19   :  { %s107_s6 = scalar_lea.vmem %s31_s15, 256  ;;  %p112_p12 = scmp.lt.s32.totalorder %s31_s15, %s31_s15 }
  0x1a   :  { %p108_p11 = scmp.ne.s32.totalorder %s31_s15, %s107_s6  ;;  %p113_p13 = scmp.lt.s32.totalorder %s107_s6, %s107_s6 }
  0x1c   :  { %p114_p0 = por %p113_p13, %p112_p12 }
  0x1e   :  { %p115_p1 = pnand %p114_p0, %p108_p11 }
  0x20   :  { %118 = shalt.err (!%p115_p1)
}
  0x21   :  { %33 = dma.hbm_to_vmem [thread:$0]  %s214_s2, 256, %s31_s15, [#allocation7]  }
  0x22   :  { %141 = dma.done.wait [#allocation4], 256  }
  0x23   :  { %142 = vsyncadd [#allocation4], 4294967040 }
  0x24   :  { %143 = dma.done.wait [#allocation7], 256  }
  0x25   :  { %144 = vsyncadd [#allocation7], 4294967040  ;;  %s41_s10 = ssub.f32 1.0, %s212_s0  ;;  %v44_v0 = vstv %s212_s0  ;;  %v42_v2 = vld [vmem:[#allocation3] sm:$0xff]  ;;  %v47_v3 = vld [vmem:[#allocation6] sm:$0xff]  ;;  %s149_s2 = smov [#allocation8]  }
  0x26   :  { %v43_v4 = vld [vmem:[#allocation3 + $0x8] sm:$0xff]  ;;  %v45_v5 = vmul.f32 %v44_v0, %v42_v2  ;;  %v48_v8 = vld [vmem:[#allocation6 + $0x8] sm:$0xff]  ;;  %s62_s13 = sshll.u32 %s149_s2, 4  ;;  %s63_s13 = int_to_ptr.vmem [resolvable:$true] %s62_s13 }
  0x27   :  { %v49_v1 = vstv %s41_s10  ;;  %v46_v7 = vmul.f32 %v44_v0, %v43_v4  ;;  %s119_s14 = scalar_lea.vmem %s63_s13, 256  ;;  %p124_p3 = scmp.lt.s32.totalorder %s63_s13, %s63_s13 }
  0x28   :  { %v50_v6 = vmul.f32 %v49_v1, %v47_v3  ;;  %v51_v9 = vmul.f32 %v49_v1, %v48_v8  ;;  %p120_p2 = scmp.ne.s32.totalorder %s63_s13, %s119_s14  ;;  %p125_p4 = scmp.lt.s32.totalorder %s119_s14, %s119_s14 }
  0x2a   :  { %v52_v10 = vadd.f32 %v50_v6, %v45_v5  ;;  %v53_v11 = vadd.f32 %v51_v9, %v46_v7  ;;  %p126_p5 = por %p125_p4, %p124_p3 }
  0x2c   :  { %54 = vst [vmem:[#allocation8] sm:$0xff] %v52_v10  ;;  %55 = vst [vmem:[#allocation8 + $0x8] sm:$0xff] %v53_v11  ;;  %p127_p6 = pnand %p126_p5, %p120_p2 }
  0x2e   :  { %130 = shalt.err (!%p127_p6)
}
  0x2f   :  { %s131_s16 = scalar_lea.hbm %s215_s3, 256 }
  0x30   :  { %p132_p7 = scmp.ne.s32.totalorder %s215_s3, %s131_s16  ;;  %p135_p8 = scmp.lt.u32.totalorder %s131_s16, %s215_s3 }
  0x32   :  { %p137_p9 = pnand %p135_p8, %p132_p7 }
  0x34   :  { %140 = shalt.err (!%p137_p9)
}
  0x35   :  { %65 = dma.vmem_to_hbm [thread:$0]  %s63_s13, 256, %s215_s3, [#allocation5]  }
  0x36   :  { %145 = dma.done.wait [#allocation5], 256  }
  0x37   :  { %146 = vsyncadd [#allocation5], 4294967040 }
  0x38   :  { %69 = vsyncpa [#allocation4], 1 }
  0x39   :  { %70 = vsyncpa [#allocation7], 1 }
  0x3a   :  { %71 = vsyncpa [#allocation5], 1 }

</bundles_post_ra>
